<compile_context>
chip_gen: v6e
topology: v6e:2x2x1
jax: 0.10.0
libtpu: 0.0.40
codegen_flags: <defaults>
</compile_context>

<pallas_src>
import functools

import jax
import jax.numpy as jnp
from jax import lax
from jax.experimental import pallas as pl
from jax.experimental.pallas import tpu as pltpu


# ----------------------------------------------------------------------------
# Kernel
# ----------------------------------------------------------------------------
def _conv_block_kernel(*refs, layer_dims):
    """Fused num_conv x (conv3x3 + affine-shift + ReLU) for ONE batch element.

    refs layout (in order):
      x_ref                          (1, H0, W0*C0)        layer-0 input
      [t_ref_l, shift_ref_l] * L     (3, Wp_l*Cin_l, Wout_l*Cout_l), (1, Wout_l*Cout_l)
      o_ref                          (1, H_last, Wout_last*Cout_last)
      [pad_ref_l] * L                VMEM scratch (Hp_l, Wp_l*Cin_l)

    layer_dims[l] = (h_in, w_in, c_in, h_out, w_out, c_out, stride)
    """
    num_conv = len(layer_dims)
    x_ref = refs[0]
    t_refs = [refs[1 + 2 * l] for l in range(num_conv)]
    s_refs = [refs[2 + 2 * l] for l in range(num_conv)]
    o_ref = refs[1 + 2 * num_conv]
    pad_refs = refs[2 + 2 * num_conv:]

    cur = x_ref[0]                                  # (h_in, w_in*c_in)
    for l, (h_in, w_in, c_in, h_out, w_out, c_out, stride) in enumerate(layer_dims):
        pad = pad_refs[l]
        # In-kernel zero padding: zero the whole padded buffer, then write the
        # current activation into its interior (row offset 1, lane offset c_in
        # == one padded column of channels on the left).
        pad[...] = jnp.zeros_like(pad)
        pad[pl.ds(1, h_in), pl.ds(c_in, w_in * c_in)] = cur.astype(pad.dtype)

        # 3 accumulating matmuls (one per kernel row dy) against block-Toeplitz
        # weights; output is directly (h_out, w_out*c_out), lane-dense.
        n_rows = stride * (h_out - 1) + 1
        acc = None
        for dy in range(3):
            rows = pad[pl.ds(dy, n_rows), :]        # (n_rows, wp*c_in)
            if stride > 1:
                rows = rows[::stride]               # (h_out, wp*c_in)
            part = jnp.dot(rows, t_refs[l][dy],
                           preferred_element_type=jnp.float32)
            acc = part if acc is None else acc + part

        # Epilogue: fused conv-bias + BN shift (scale already folded into the
        # weights), then ReLU — all on lane-dense (h_out, w_out*c_out).
        cur = jnp.maximum(acc + s_refs[l][...], 0.0)

    o_ref[0] = cur.astype(o_ref.dtype)


# ----------------------------------------------------------------------------
# Parameter preparation (host/XLA side, once per call)
# ----------------------------------------------------------------------------
def _fold_bn(p, eps=1e-5):
    """Fold conv bias + eval-mode BatchNorm into (scaled weights, shift)."""
    inv = p["gamma"] / jnp.sqrt(p["var"] + eps)          # (C_out,)
    wf = p["w"] * inv                                    # (3,3,Cin,Cout)
    shift = p["b"] * inv + p["beta"] - p["mean"] * inv   # (C_out,)
    return wf, shift


def _build_block_toeplitz(wf, w_in, stride):
    """(3,3,Cin,Cout) folded weights -> (3, Wp*Cin, Wout*Cout) Toeplitz mats.

    T[dy, (w*stride+dx)*Cin + ci, w*Cout + co] = wf[dy, dx, ci, co].
    Multiplying padded activation rows (H_out, Wp*Cin) by T[dy] and summing
    over dy gives the conv output directly in (H_out, Wout*Cout) layout.
    """
    c_in, c_out = wf.shape[2], wf.shape[3]
    wp = w_in + 2
    w_out = (w_in + 2 - 3) // stride + 1
    t = jnp.zeros((3, wp * c_in, w_out * c_out), jnp.float32)
    for dx in range(3):
        blk = wf[:, dx].astype(jnp.float32)              # (3, Cin, Cout)
        for wo in range(w_out):
            r0 = (wo * stride + dx) * c_in
            c0 = wo * c_out
            t = t.at[:, r0:r0 + c_in, c0:c0 + c_out].set(blk)
    return t, w_out


def _prepare_layers(params, h, w, stride):
    layers = []
    for i, p in enumerate(params):
        s = stride if i == 0 else 1
        c_in, c_out = p["w"].shape[2], p["w"].shape[3]
        wf, shift = _fold_bn(p)
        t, w_out = _build_block_toeplitz(wf, w, s)
        h_out = (h + 2 - 3) // s + 1
        shift_tiled = jnp.tile(shift[None, :].astype(jnp.float32), (1, w_out))
        layers.append(dict(t=t, shift=shift_tiled,
                           dims=(h, w, c_in, h_out, w_out, c_out, s)))
        h, w = h_out, w_out
    return layers


# ----------------------------------------------------------------------------
# Public forward (NCHW in / NCHW out, matching the PyTorch module)
# ----------------------------------------------------------------------------
def conv_block_forward(params, x_nchw, stride):
    n, c_in0, h, w = x_nchw.shape
    layers = _prepare_layers(params, h, w, stride)
    d_last = layers[-1]["dims"]
    h_last, w_last, c_last = d_last[3], d_last[4], d_last[5]

    # NCHW -> NHWC -> (N, H, W*C): lane axis holds (W, C) interleaved.
    x = jnp.transpose(x_nchw, (0, 2, 3, 1)).reshape(n, h, w * c_in0)

    in_specs = [pl.BlockSpec((1, h, w * c_in0), lambda i: (i, 0, 0))]
    args = [x]
    for lay in layers:
        in_specs.append(pl.BlockSpec(lay["t"].shape, lambda i: (0, 0, 0)))
        in_specs.append(pl.BlockSpec(lay["shift"].shape, lambda i: (0, 0)))
        args += [lay["t"], lay["shift"]]

    # One padded-activation scratch per layer: (H_in+2, (W_in+2)*C_in), f32.
    scratch_shapes = [
        pltpu.VMEM((d[0] + 2, (d[1] + 2) * d[2]), jnp.float32)
        for d in (lay["dims"] for lay in layers)
    ]

    kernel = functools.partial(
        _conv_block_kernel,
        layer_dims=tuple(lay["dims"] for lay in layers))

    out = pl.pallas_call(
        kernel,
        out_shape=jax.ShapeDtypeStruct((n, h_last, w_last * c_last),
                                       x_nchw.dtype),
        grid_spec=pltpu.PrefetchScalarGridSpec(
            num_scalar_prefetch=0,
            grid=(n,),
            in_specs=in_specs,
            out_specs=pl.BlockSpec((1, h_last, w_last * c_last),
                                   lambda i: (i, 0, 0)),
            scratch_shapes=scratch_shapes,
        ),
        compiler_params=pltpu.CompilerParams(
            dimension_semantics=("parallel",)),
    )(*args)

    out = out.reshape(n, h_last, w_last, c_last)
    return jnp.transpose(out, (0, 3, 1, 2))              # NHWC -> NCHW


# ----------------------------------------------------------------------------
# Reference + synthetic params
# ----------------------------------------------------------------------------
def init_conv_block_params(key, in_ch, out_ch, num_conv):
    """Deterministic synthetic params mirroring Conv3x3 + BatchNorm2d shapes."""
    params = []
    for i in range(num_conv):
        ci = in_ch if i == 0 else out_ch
        key, k1, k2, k3, k4 = jax.random.split(key, 5)
        params.append(dict(
            w=0.1 * jax.random.normal(k1, (3, 3, ci, out_ch), jnp.float32),
            b=0.05 * jax.random.normal(k2, (out_ch,), jnp.float32),
            gamma=1.0 + 0.1 * jax.random.normal(k3, (out_ch,), jnp.float32),
            beta=0.1 * jax.random.normal(k4, (out_ch,), jnp.float32),
            mean=jnp.zeros((out_ch,), jnp.float32),      # running_mean
            var=jnp.ones((out_ch,), jnp.float32),        # running_var
        ))
    return params


def conv_block_reference(params, x_nchw, stride):
    """Pure-JAX reference (lax conv) for correctness checking."""
    eps = 1e-5
    x = x_nchw
    for i, p in enumerate(params):
        s = stride if i == 0 else 1
        w_oihw = jnp.transpose(p["w"], (3, 2, 0, 1))     # HWIO -> OIHW
        y = lax.conv_general_dilated(
            x, w_oihw, window_strides=(s, s), padding=((1, 1), (1, 1)),
            dimension_numbers=("NCHW", "OIHW", "NCHW"))
        y = y + p["b"].reshape(1, -1, 1, 1)
        inv = p["gamma"] / jnp.sqrt(p["var"] + eps)
        y = (y - p["mean"].reshape(1, -1, 1, 1)) * inv.reshape(1, -1, 1, 1) \
            + p["beta"].reshape(1, -1, 1, 1)
        x = jnp.maximum(y, 0.0)
    return x


if __name__ == "__main__":
    # convBlock(in_ch=4, out_ch=8, stride=1, norm='bn', num_conv=2)
    in_ch, out_ch, stride, num_conv = 4, 8, 1, 2
    key = jax.random.PRNGKey(0)
    key_x, key_p = jax.random.split(key)
    x = jax.random.normal(key_x, (2, in_ch, 16, 16), jnp.float32)  # NCHW

    params = init_conv_block_params(key_p, in_ch, out_ch, num_conv)

    fwd = jax.jit(conv_block_forward, static_argnums=(2,))
    out = jax.block_until_ready(fwd(params, x, stride))
    ref = jax.block_until_ready(conv_block_reference(params, x, stride))

    assert out.shape == (2, out_ch, 16, 16), out.shape
    err = float(jnp.max(jnp.abs(out - ref)))
    # BN scale is folded into the weights -> tiny fp-rounding differences only.
    assert jnp.allclose(out, ref, atol=2e-4, rtol=2e-4), err
    print("KERNEL_OK")
</pallas_src>

<mosaic_0001>
module attributes {stable_mosaic.version = 11 : i64} {
  func.func @_conv_block_kernel(%arg0: i32, %arg1: memref<1x16x64xf32, #tpu.memory_space<vmem>>, %arg2: memref<3x72x128xf32, #tpu.memory_space<vmem>>, %arg3: memref<1x128xf32, #tpu.memory_space<vmem>>, %arg4: memref<3x144x128xf32, #tpu.memory_space<vmem>>, %arg5: memref<1x128xf32, #tpu.memory_space<vmem>>, %arg6: memref<1x16x128xf32, #tpu.memory_space<vmem>>, %arg7: memref<18x72xf32, #tpu.memory_space<vmem>>, %arg8: memref<18x144xf32, #tpu.memory_space<vmem>>) attributes {dimension_semantics = [#tpu.dimension_semantics<parallel>], iteration_bounds = array<i64: 2>, scalar_prefetch = 0 : i64, scratch_operands = 2 : i64, tpu.core_type = #tpu.core_type<tc>, window_params = [{transform_indices = @transform_0, window_bounds = array<i64: 1, 16, 64>}, {pipeline_mode = #tpu.pipeline_mode<synchronous>, transform_indices = @transform_1, window_bounds = array<i64: 3, 72, 128>}, {pipeline_mode = #tpu.pipeline_mode<synchronous>, transform_indices = @transform_2, window_bounds = array<i64: 1, 128>}, {pipeline_mode = #tpu.pipeline_mode<synchronous>, transform_indices = @transform_3, window_bounds = array<i64: 3, 144, 128>}, {pipeline_mode = #tpu.pipeline_mode<synchronous>, transform_indices = @transform_4, window_bounds = array<i64: 1, 128>}, {transform_indices = @transform_5, window_bounds = array<i64: 1, 16, 128>}]} {
    %c0 = arith.constant 0 : index
    %c0_0 = arith.constant 0 : index
    %c0_1 = arith.constant 0 : index
    %0 = vector.load %arg1[%c0, %c0_0, %c0_1] : memref<1x16x64xf32, #tpu.memory_space<vmem>>, vector<1x16x64xf32>
    %1 = vector.shape_cast %0 : vector<1x16x64xf32> to vector<16x64xf32>
    %cst = arith.constant 0.000000e+00 : f32
    %2 = vector.broadcast %cst : f32 to vector<18x72xf32>
    %c0_2 = arith.constant 0 : index
    %c0_3 = arith.constant 0 : index
    %3 = vector.load %arg7[%c0_2, %c0_3] : memref<18x72xf32, #tpu.memory_space<vmem>>, vector<18x72xf32>
    tpu.vector_store %arg7[%c0_2, %c0_3], %2 {strides = array<i32>} : memref<18x72xf32, #tpu.memory_space<vmem>>, vector<18x72xf32>,
    %c1 = arith.constant 1 : index
    %c4 = arith.constant 4 : index
    %4 = vector.load %arg7[%c1, %c4] : memref<18x72xf32, #tpu.memory_space<vmem>>, vector<16x64xf32>
    tpu.vector_store %arg7[%c1, %c4], %1 {strides = array<i32>} : memref<18x72xf32, #tpu.memory_space<vmem>>, vector<16x64xf32>,
    %c0_4 = arith.constant 0 : index
    %c0_5 = arith.constant 0 : index
    %5 = vector.load %arg7[%c0_4, %c0_5] : memref<18x72xf32, #tpu.memory_space<vmem>>, vector<16x72xf32>
    %c0_6 = arith.constant 0 : index
    %c0_7 = arith.constant 0 : index
    %c0_8 = arith.constant 0 : index
    %6 = vector.load %arg2[%c0_6, %c0_7, %c0_8] : memref<3x72x128xf32, #tpu.memory_space<vmem>>, vector<1x72x128xf32>
    %7 = vector.shape_cast %6 : vector<1x72x128xf32> to vector<72x128xf32>
    %cst_9 = arith.constant dense<0.000000e+00> : vector<16x128xf32>
    %8 = tpu.matmul %5, %7, %cst_9 {dimension_numbers = #tpu.dot_dimension_numbers<[1], [0], [0], [1], [0, 0, 1, 1], [], []>} : vector<16x72xf32>, vector<72x128xf32>, vector<16x128xf32> -> vector<16x128xf32>
    %c1_10 = arith.constant 1 : index
    %c0_11 = arith.constant 0 : index
    %9 = vector.load %arg7[%c1_10, %c0_11] : memref<18x72xf32, #tpu.memory_space<vmem>>, vector<16x72xf32>
    %c1_12 = arith.constant 1 : index
    %c0_13 = arith.constant 0 : index
    %c0_14 = arith.constant 0 : index
    %10 = vector.load %arg2[%c1_12, %c0_13, %c0_14] : memref<3x72x128xf32, #tpu.memory_space<vmem>>, vector<1x72x128xf32>
    %11 = vector.shape_cast %10 : vector<1x72x128xf32> to vector<72x128xf32>
    %cst_15 = arith.constant dense<0.000000e+00> : vector<16x128xf32>
    %12 = tpu.matmul %9, %11, %cst_15 {dimension_numbers = #tpu.dot_dimension_numbers<[1], [0], [0], [1], [0, 0, 1, 1], [], []>} : vector<16x72xf32>, vector<72x128xf32>, vector<16x128xf32> -> vector<16x128xf32>
    %13 = arith.addf %8, %12 : vector<16x128xf32>
    %c2 = arith.constant 2 : index
    %c0_16 = arith.constant 0 : index
    %14 = vector.load %arg7[%c2, %c0_16] : memref<18x72xf32, #tpu.memory_space<vmem>>, vector<16x72xf32>
    %c2_17 = arith.constant 2 : index
    %c0_18 = arith.constant 0 : index
    %c0_19 = arith.constant 0 : index
    %15 = vector.load %arg2[%c2_17, %c0_18, %c0_19] : memref<3x72x128xf32, #tpu.memory_space<vmem>>, vector<1x72x128xf32>
    %16 = vector.shape_cast %15 : vector<1x72x128xf32> to vector<72x128xf32>
    %cst_20 = arith.constant dense<0.000000e+00> : vector<16x128xf32>
    %17 = tpu.matmul %14, %16, %cst_20 {dimension_numbers = #tpu.dot_dimension_numbers<[1], [0], [0], [1], [0, 0, 1, 1], [], []>} : vector<16x72xf32>, vector<72x128xf32>, vector<16x128xf32> -> vector<16x128xf32>
    %18 = arith.addf %13, %17 : vector<16x128xf32>
    %c0_21 = arith.constant 0 : index
    %c0_22 = arith.constant 0 : index
    %19 = vector.load %arg3[%c0_21, %c0_22] : memref<1x128xf32, #tpu.memory_space<vmem>>, vector<1x128xf32>
    %20 = vector.broadcast %19 : vector<1x128xf32> to vector<16x128xf32>
    %21 = arith.addf %18, %20 : vector<16x128xf32>
    %cst_23 = arith.constant 0.000000e+00 : f32
    %22 = vector.broadcast %cst_23 : f32 to vector<16x128xf32>
    %23 = arith.maximumf %21, %22 : vector<16x128xf32>
    %cst_24 = arith.constant 0.000000e+00 : f32
    %24 = vector.broadcast %cst_24 : f32 to vector<18x144xf32>
    %c0_25 = arith.constant 0 : index
    %c0_26 = arith.constant 0 : index
    %25 = vector.load %arg8[%c0_25, %c0_26] : memref<18x144xf32, #tpu.memory_space<vmem>>, vector<18x144xf32>
    tpu.vector_store %arg8[%c0_25, %c0_26], %24 {strides = array<i32>} : memref<18x144xf32, #tpu.memory_space<vmem>>, vector<18x144xf32>,
    %c1_27 = arith.constant 1 : index
    %c8 = arith.constant 8 : index
    %26 = vector.load %arg8[%c1_27, %c8] : memref<18x144xf32, #tpu.memory_space<vmem>>, vector<16x128xf32>
    tpu.vector_store %arg8[%c1_27, %c8], %23 {strides = array<i32>} : memref<18x144xf32, #tpu.memory_space<vmem>>, vector<16x128xf32>,
    %c0_28 = arith.constant 0 : index
    %c0_29 = arith.constant 0 : index
    %27 = vector.load %arg8[%c0_28, %c0_29] : memref<18x144xf32, #tpu.memory_space<vmem>>, vector<16x144xf32>
    %c0_30 = arith.constant 0 : index
    %c0_31 = arith.constant 0 : index
    %c0_32 = arith.constant 0 : index
    %28 = vector.load %arg4[%c0_30, %c0_31, %c0_32] : memref<3x144x128xf32, #tpu.memory_space<vmem>>, vector<1x144x128xf32>
    %29 = vector.shape_cast %28 : vector<1x144x128xf32> to vector<144x128xf32>
    %cst_33 = arith.constant dense<0.000000e+00> : vector<16x128xf32>
    %30 = tpu.matmul %27, %29, %cst_33 {dimension_numbers = #tpu.dot_dimension_numbers<[1], [0], [0], [1], [0, 0, 1, 1], [], []>} : vector<16x144xf32>, vector<144x128xf32>, vector<16x128xf32> -> vector<16x128xf32>
    %c1_34 = arith.constant 1 : index
    %c0_35 = arith.constant 0 : index
    %31 = vector.load %arg8[%c1_34, %c0_35] : memref<18x144xf32, #tpu.memory_space<vmem>>, vector<16x144xf32>
    %c1_36 = arith.constant 1 : index
    %c0_37 = arith.constant 0 : index
    %c0_38 = arith.constant 0 : index
    %32 = vector.load %arg4[%c1_36, %c0_37, %c0_38] : memref<3x144x128xf32, #tpu.memory_space<vmem>>, vector<1x144x128xf32>
    %33 = vector.shape_cast %32 : vector<1x144x128xf32> to vector<144x128xf32>
    %cst_39 = arith.constant dense<0.000000e+00> : vector<16x128xf32>
    %34 = tpu.matmul %31, %33, %cst_39 {dimension_numbers = #tpu.dot_dimension_numbers<[1], [0], [0], [1], [0, 0, 1, 1], [], []>} : vector<16x144xf32>, vector<144x128xf32>, vector<16x128xf32> -> vector<16x128xf32>
    %35 = arith.addf %30, %34 : vector<16x128xf32>
    %c2_40 = arith.constant 2 : index
    %c0_41 = arith.constant 0 : index
    %36 = vector.load %arg8[%c2_40, %c0_41] : memref<18x144xf32, #tpu.memory_space<vmem>>, vector<16x144xf32>
    %c2_42 = arith.constant 2 : index
    %c0_43 = arith.constant 0 : index
    %c0_44 = arith.constant 0 : index
    %37 = vector.load %arg4[%c2_42, %c0_43, %c0_44] : memref<3x144x128xf32, #tpu.memory_space<vmem>>, vector<1x144x128xf32>
    %38 = vector.shape_cast %37 : vector<1x144x128xf32> to vector<144x128xf32>
    %cst_45 = arith.constant dense<0.000000e+00> : vector<16x128xf32>
    %39 = tpu.matmul %36, %38, %cst_45 {dimension_numbers = #tpu.dot_dimension_numbers<[1], [0], [0], [1], [0, 0, 1, 1], [], []>} : vector<16x144xf32>, vector<144x128xf32>, vector<16x128xf32> -> vector<16x128xf32>
    %40 = arith.addf %35, %39 : vector<16x128xf32>
    %c0_46 = arith.constant 0 : index
    %c0_47 = arith.constant 0 : index
    %41 = vector.load %arg5[%c0_46, %c0_47] : memref<1x128xf32, #tpu.memory_space<vmem>>, vector<1x128xf32>
    %42 = vector.broadcast %41 : vector<1x128xf32> to vector<16x128xf32>
    %43 = arith.addf %40, %42 : vector<16x128xf32>
    %cst_48 = arith.constant 0.000000e+00 : f32
    %44 = vector.broadcast %cst_48 : f32 to vector<16x128xf32>
    %45 = arith.maximumf %43, %44 : vector<16x128xf32>
    %c0_49 = arith.constant 0 : index
    %c0_50 = arith.constant 0 : index
    %c0_51 = arith.constant 0 : index
    %46 = vector.load %arg6[%c0_49, %c0_50, %c0_51] : memref<1x16x128xf32, #tpu.memory_space<vmem>>, vector<1x16x128xf32>
    %47 = vector.shape_cast %46 : vector<1x16x128xf32> to vector<16x128xf32>
    %48 = vector.shape_cast %45 : vector<16x128xf32> to vector<1x16x128xf32>
    tpu.vector_store %arg6[%c0_49, %c0_50, %c0_51], %48 {strides = array<i32>} : memref<1x16x128xf32, #tpu.memory_space<vmem>>, vector<1x16x128xf32>,
    return
  }
  func.func @transform_0(%arg0: i32) -> (i32, i32, i32) {
    %c0_i32 = arith.constant 0 : i32
    %c0_i32_0 = arith.constant 0 : i32
    %c0_i32_1 = arith.constant 0 : i32
    return %arg0, %c0_i32, %c0_i32_0 : i32, i32, i32
  }
  func.func @transform_1(%arg0: i32) -> (i32, i32, i32) {
    %c0_i32 = arith.constant 0 : i32
    %c0_i32_0 = arith.constant 0 : i32
    %c0_i32_1 = arith.constant 0 : i32
    %c0_i32_2 = arith.constant 0 : i32
    return %c0_i32, %c0_i32_0, %c0_i32_1 : i32, i32, i32
  }
  func.func @transform_2(%arg0: i32) -> (i32, i32) {
    %c0_i32 = arith.constant 0 : i32
    %c0_i32_0 = arith.constant 0 : i32
    %c0_i32_1 = arith.constant 0 : i32
    return %c0_i32, %c0_i32_0 : i32, i32
  }
  func.func @transform_3(%arg0: i32) -> (i32, i32, i32) {
    %c0_i32 = arith.constant 0 : i32
    %c0_i32_0 = arith.constant 0 : i32
    %c0_i32_1 = arith.constant 0 : i32
    %c0_i32_2 = arith.constant 0 : i32
    return %c0_i32, %c0_i32_0, %c0_i32_1 : i32, i32, i32
  }
  func.func @transform_4(%arg0: i32) -> (i32, i32) {
    %c0_i32 = arith.constant 0 : i32
    %c0_i32_0 = arith.constant 0 : i32
    %c0_i32_1 = arith.constant 0 : i32
    return %c0_i32, %c0_i32_0 : i32, i32
  }
  func.func @transform_5(%arg0: i32) -> (i32, i32, i32) {
    %c0_i32 = arith.constant 0 : i32
    %c0_i32_0 = arith.constant 0 : i32
    %c0_i32_1 = arith.constant 0 : i32
    return %arg0, %c0_i32, %c0_i32_0 : i32, i32, i32
  }
}

</mosaic_0001>

<bundles_post_ra>
// kernel: conv_block_forward.1
= control target key start
LH: loop header
LB: loop body
LE: loop exit
PB: predicated region body
PF: predicated region fallthrough
CT: control target
= control target key end

     0   :  { %s1210_s18 = smov 0   ;;  %s1584_s0 = inlined_call_operand.vmem [shape: f32[2,16,64], index: 0, kind: input, shape index: {}]   ;;  %s1585_s1 = inlined_call_operand.vmem [shape: f32[3,72,128], index: 1, kind: input, shape index: {}]   ;;  %s1586_s2 = inlined_call_operand.vmem [shape: f32[1,128], index: 2, kind: input, shape index: {}]   ;;  %s1587_s3 = inlined_call_operand.vmem [shape: f32[3,144,128], index: 3, kind: input, shape index: {}]   ;;  %s1588_s4 = inlined_call_operand.vmem [shape: f32[1,128], index: 4, kind: input, shape index: {}]   ;;  %s1589_s5 = inlined_call_operand.vmem [shape: f32[2,16,128], index: 5, kind: output, shape index: {}]  }
   0x1 LB: > { %s981_s19 = sadd.s32 4294967295, %s1175_s18   ;;  %p985_p0 = scmp.ge.s32.totalorder %s1175_s18, 1  ;;  %s1175_s18 = sphi %s1210_s18, %s15_s18  }
   0x2   : > { %p187_p1 = scmp.lt.s32.totalorder %s1175_s18, 3 }
   0x4   : > { %p188_p2 = pnand %p985_p0, %p187_p1 }
   0x5   : > { %p215_p3 = scmp.lt.s32.totalorder (!%p188_p2), %s981_s19, 1  ;;  %s1178_s17 = smov (!%p188_p2), 4  }
   0x6   : > { %191 = sbr.rel (%p188_p2) target bundleno = 738 (0x2e2), region = 40  ;;  %s1179_s16 = smov (!%p188_p2), 8  }
   0xb   : > { %v998_v0 = vld [vmem:[%s1585_s1 + $0x88] sm:$0xff]  ;;  %v253_v1 = vld [vmem:[%s1585_s1 + $0x40] sm:$0xff]  ;;  %vm227_vm0 = vcmask 588800   ;;  %v252_v3 = vld [vmem:[%s1585_s1 + $0x38] sm:$0xff]  ;;  %vm230_vm1 = vcmask 582656   ;;  %s1591_s19 = smov (!%p215_p3, %s981_s19), 1 }
   0xc   : > { %v997_v2 = vld [vmem:[%s1585_s1 + $0x80] sm:$0xff]  ;;  %1095 = vmatprep.subr.mxu0 %v998_v0  ;;  %1116 = vmatprep.subr.mxu1 %v253_v1  ;;  %v996_v4 = vld [vmem:[%s1585_s1 + $0x78] sm:$0xff]  ;;  %v251_v5 = vld [vmem:[%s1585_s1 + $0x30] sm:$0xff]  ;;  %v1177_v6 = vmov 0.0   ;;  %s1060_s7 = sshll.u32 %s1591_s19, 4  ;;  %vm240_vm2 = vcmask 556064  }
   0xd   : > { %1096 = vmatpush3.msra.mxu0 %v998_v0  ;;  %1117 = vmatpush3.msra.mxu1 %v253_v1  ;;  %228 = vst.msk [vmem:[#allocation2] sm:$0xff] %vm227_vm0, %v1177_v6  ;;  %229 = vst.msk [vmem:[#allocation2 + $0x8] sm:$0xff] %vm227_vm0, %v1177_v6  ;;  %v995_v7 = vld [vmem:[%s1585_s1 + $0x70] sm:$0xff]  ;;  %s219_s12 = scalar_lea.vmem %s1584_s0, %s1060_s7  ;;  %v250_v8 = vld [vmem:[%s1585_s1 + $0x28] sm:$0xff]  ;;  %vm540_vm3 = vcmask 123904   ;;  %vm535_vm4 = vcmask 130048   ;;  %s224_s15 = scalar_lea.vmem %s1589_s5, %s1060_s7 }
   0xe   : > { %534 = vst [vmem:[#allocation3] sm:$0xff] %v1177_v6  ;;  %537 = vst [vmem:[#allocation3 + $0x10] sm:$0xff] %v1177_v6  ;;  %1097 = vmatprep.subr.mxu0 %v997_v2  ;;  %1118 = vmatprep.subr.mxu1 %v252_v3  ;;  %v225_v9 = vld [vmem:[%s219_s12] sm:$0xff]  ;;  %v994_v10 = vld [vmem:[%s1585_s1 + $0x68] sm:$0xff]  ;;  %vm544_vm5 = vcmask 1040384   ;;  %vm565_vm6 = vcmask 1040448  }
   0xf   : > { %539 = vst [vmem:[#allocation3 + $0x20] sm:$0x3] %v1177_v6  ;;  %231 = vst.msk [vmem:[#allocation2 + $0x10] sm:$0x3] %vm230_vm1, %v1177_v6  ;;  %1098 = vmatpush3.msra.mxu0 %v997_v2  ;;  %1119 = vmatpush3.msra.mxu1 %v252_v3  ;;  %v249_v11 = vld [vmem:[%s1585_s1 + $0x20] sm:$0xff]  ;;  %v226_v12 = vld [vmem:[%s219_s12 + $0x8] sm:$0xff] }
  0x10   : > { %1099 = vmatprep.subr.mxu0 %v996_v4  ;;  %1120 = vmatprep.subr.mxu1 %v251_v5  ;;  %v993_v13 = vld [vmem:[%s1585_s1 + $0x60] sm:$0xff]  ;;  %v248_v14 = vld [vmem:[%s1585_s1 + $0x18] sm:$0xff]  ;;  %v247_v16 = vld [vmem:[%s1585_s1 + $0x10] sm:$0xff]  ;;  %541 = vst.msk [vmem:[#allocation3 + $0x28] sm:$0x3] %vm540_vm3, %v1177_v6  ;;  %vm567_vm7 = vcmask 57344  }
  0x11   : > { %1100 = vmatpush3.msra.mxu0 %v996_v4  ;;  %1121 = vmatpush3.msra.mxu1 %v251_v5  ;;  %v992_v15 = vld [vmem:[%s1585_s1 + $0x58] sm:$0xff]  ;;  %v991_v17 = vld [vmem:[%s1585_s1 + $0x50] sm:$0xff]  ;;  %v246_v18 = vld [vmem:[%s1585_s1 + $0x8] sm:$0xff]  ;;  %536 = vst.msk [vmem:[#allocation3 + $0x8] sm:$0xff] %vm535_vm4, %v1177_v6  ;;  %vm557_vm8 = vcmask 1047617   ;;  %vm559_vm9 = vcmask 64513  }
  0x12   : > { %234 = vrot.lane.b32.xlu0 %v225_v9, %s1178_s17  ;;  %1101 = vmatprep.subr.mxu0 %v995_v7  ;;  %v990_v19 = vld [vmem:[%s1585_s1 + $0x48] sm:$0xff]  ;;  %v245_v20 = vld [vmem:[%s1585_s1] sm:$0xff]  ;;  %v1011_v21 = vld [vmem:[%s1585_s1 + $0xd0] sm:$0xff]  ;;  %538 = vst.msk [vmem:[#allocation3 + $0x18] sm:$0xff] %vm535_vm4, %v1177_v6  ;;  %vm561_vm10 = vcmask 1047616   ;;  %vm563_vm11 = vcmask 64512  }
  0x13   : > { %1102 = vmatpush3.msra.mxu0 %v995_v7  ;;  %1122 = vmatprep.subr.mxu1 %v250_v8  ;;  %v1010_v26 = vld [vmem:[%s1585_s1 + $0xc8] sm:$0xff]  ;;  %v1009_v30 = vld [vmem:[%s1585_s1 + $0xc0] sm:$0xff]  ;;  %v1008_v31 = vld [vmem:[%s1585_s1 + $0xb8] sm:$0xff]  ;;  %vm620_vm12 = vcmask 1046528   ;;  %vm819_vm13 = vcmask 1045504  }
  0x14   : > { %1103 = vmatprep.subr.mxu0 %v994_v10  ;;  %1123 = vmatpush3.msra.mxu1 %v250_v8  ;;  %v1007_v32 = vld [vmem:[%s1585_s1 + $0xb0] sm:$0xff]  ;;  %v1006_v33 = vld [vmem:[%s1585_s1 + $0xa8] sm:$0xff]  ;;  %v1005_v34 = vld [vmem:[%s1585_s1 + $0xa0] sm:$0xff] }
  0x15   : > { %1104 = vmatpush3.msra.mxu0 %v994_v10  ;;  %1124 = vmatprep.subr.mxu1 %v249_v11  ;;  %v1004_v35 = vld [vmem:[%s1585_s1 + $0x98] sm:$0xff]  ;;  %v1003_v36 = vld [vmem:[%s1585_s1 + $0x90] sm:$0xff]  ;;  %v1030_v40 = vld [vmem:[%s1587_s3 + $0x108] sm:$0xff] }
  0x16   : > { %236 = vrot.lane.b32.xlu0 %v226_v12, %s1178_s17  ;;  %1105 = vmatprep.subr.mxu0 %v993_v13  ;;  %v588_v38 = vld [vmem:[%s1587_s3 + $0x78] sm:$0xff]  ;;  %v587_v39 = vld [vmem:[%s1587_s3 + $0x70] sm:$0xff]  ;;  %v1029_v41 = vld [vmem:[%s1587_s3 + $0x100] sm:$0xff] }
  0x17   : > { %1125 = vmatpush3.msra.mxu1 %v249_v11  ;;  %1106 = vmatpush3.msra.mxu0 %v993_v13  ;;  %v586_v42 = vld [vmem:[%s1587_s3 + $0x68] sm:$0xff]  ;;  %v1028_v43 = vld [vmem:[%s1587_s3 + $0xf8] sm:$0xff]  ;;  %v585_v44 = vld [vmem:[%s1587_s3 + $0x60] sm:$0xff] }
  0x18   : > { %1126 = vmatprep.subr.mxu1 %v248_v14  ;;  %1107 = vmatprep.subr.mxu0 %v992_v15  ;;  %v1027_v45 = vld [vmem:[%s1587_s3 + $0xf0] sm:$0xff]  ;;  %v584_v46 = vld [vmem:[%s1587_s3 + $0x58] sm:$0xff]  ;;  %v1026_v47 = vld [vmem:[%s1587_s3 + $0xe8] sm:$0xff] }
  0x19   : > { %1127 = vmatpush3.msra.mxu1 %v248_v14  ;;  %1108 = vmatpush3.msra.mxu0 %v992_v15  ;;  %v583_v48 = vld [vmem:[%s1587_s3 + $0x50] sm:$0xff]  ;;  %v1025_v49 = vld [vmem:[%s1587_s3 + $0xe0] sm:$0xff]  ;;  %v582_v50 = vld [vmem:[%s1587_s3 + $0x48] sm:$0xff] }
  0x1a   : > { %1128 = vmatprep.subr.mxu1 %v247_v16  ;;  %1109 = vmatprep.subr.mxu0 %v991_v17  ;;  %v1024_v51 = vld [vmem:[%s1587_s3 + $0xd8] sm:$0xff]  ;;  %v581_v52 = vld [vmem:[%s1587_s3 + $0x40] sm:$0xff]  ;;  %v1023_v53 = vld [vmem:[%s1587_s3 + $0xd0] sm:$0xff] }
  0x1b   : > { %1129 = vmatpush3.msra.mxu1 %v247_v16  ;;  %1110 = vmatpush3.msra.mxu0 %v991_v17  ;;  %v580_v54 = vld [vmem:[%s1587_s3 + $0x38] sm:$0xff]  ;;  %v1022_v55 = vld [vmem:[%s1587_s3 + $0xc8] sm:$0xff]  ;;  %v579_v56 = vld [vmem:[%s1587_s3 + $0x30] sm:$0xff] }
  0x1c   : > { %1130 = vmatprep.subr.mxu1 %v246_v18  ;;  %1111 = vmatprep.subr.mxu0 %v990_v19  ;;  %v578_v57 = vld [vmem:[%s1587_s3 + $0x28] sm:$0xff]  ;;  %v577_v58 = vld [vmem:[%s1587_s3 + $0x20] sm:$0xff]  ;;  %v576_v62 = vld [vmem:[%s1587_s3 + $0x18] sm:$0xff] }
  0x1d   : > { %1131 = vmatpush3.msra.mxu1 %v246_v18  ;;  %1112 = vmatpush3.msra.mxu0 %v990_v19  ;;  %v1021_v61 = vld [vmem:[%s1587_s3 + $0xc0] sm:$0xff]  ;;  %v1020_v63 = vld [vmem:[%s1587_s3 + $0xb8] sm:$0xff]  ;;  %v575_v0 = vld [vmem:[%s1587_s3 + $0x10] sm:$0xff] }
  0x1e   : > { %1132 = vmatprep.subr.mxu1 %v245_v20  ;;  %1137 = vmatprep.subr.mxu0 %v1011_v21  ;;  %v1019_v3 = vld [vmem:[%s1587_s3 + $0xb0] sm:$0xff]  ;;  %v574_v4 = vld [vmem:[%s1587_s3 + $0x8] sm:$0xff]  ;;  %v1014_v8 = vld [vmem:[%s1586_s2] ss:$0 sm:$0xff] }
  0x1f   : > { %1133 = vmatpush3.msra.mxu1 %v245_v20  ;;  %v1018_v11 = vld [vmem:[%s1587_s3 + $0xa8] sm:$0xff]  ;;  %v573_v12 = vld [vmem:[%s1587_s3] sm:$0xff]  ;;  %v1016_v18 = vld [vmem:[%s1587_s3 + $0x98] sm:$0xff] }
  0x20   : > { %637 = vmatprep.subr.mxu1 %v1177_v6  ;;  %v1017_v14 = vld [vmem:[%s1587_s3 + $0xa0] sm:$0xff]  ;;  %v590_v15 = vld [vmem:[%s1587_s3 + $0x88] sm:$0xff] }
  0x21   : > { %v589_v19 = vld [vmem:[%s1587_s3 + $0x80] sm:$0xff] }
  0x84   : > { %v235_v22 = vpop.permute.xlu0 %234 }
  0x85   : > { %241 = vst.msk [vmem:[#allocation2 + $0x1] sm:$0xff] %vm240_vm2, %v235_v22 }
  0x88   : > { %v237_v23 = vpop.permute.xlu0 %236 }
  0x89   : > { %242 = vst.msk [vmem:[#allocation2 + $0x9] sm:$0xff] %vm240_vm2, %v237_v23 }
  0x8c   : > { %v254_v24 = vld [vmem:[#allocation2 + $0x1] sm:$0xff] }
  0x8d   : > { %v243_v25 = vld [vmem:[#allocation2] sm:$0xff]  ;;  %1113 = vmatprep.mubr.msk.f32.mxu0 %vm227_vm0, %v254_v24  ;;  %v1015_v24 = vld [vmem:[%s1587_s3 + $0x90] sm:$0xff] }
  0x8e   : > { %1134 = vmatprep.mubr.msk.f32.mxu1 %vm227_vm0, %v243_v25  ;;  %v1032_v25 = vld [vmem:[%s1587_s3 + $0x118] sm:$0xff] }
  0x90   : > { %v255_v27 = vld [vmem:[#allocation2 + $0x9] sm:$0xff] }
  0x91   : > { %v244_v28 = vld [vmem:[#allocation2 + $0x8] sm:$0xff]  ;;  %1114 = vmatmul.mubr.msk.f32.vlgmr.msra.gmra.mxu0 %vm227_vm0, %v255_v27  ;;  %v1031_v27 = vld [vmem:[%s1587_s3 + $0x110] sm:$0xff] }
  0x92   : > { %v428_v29 = vld [vmem:[#allocation2 + $0x2] sm:$0xff]  ;;  %1135 = vmatmul.mubr.msk.f32.vlgmr.msra.gmra.mxu1 %vm227_vm0, %v244_v28  ;;  %1138 = vmatpush3.msra.mxu0 %v1011_v21  ;;  %v429_v37 = vld [vmem:[#allocation2 + $0xa] sm:$0xff] }
  0x93   : > { %1155 = vmatprep.mubr.msk.f32.mxu0 %vm227_vm0, %v428_v29  ;;  %1139 = vmatprep.subr.mxu0 %v1010_v26 }
  0x94   : > { %1140 = vmatpush3.msra.mxu0 %v1010_v26  ;;  %638 = vmatpush1.msra.mxu1 %v1030_v40 }
  0x95   : > { %1141 = vmatprep.subr.mxu0 %v1009_v30  ;;  %639 = vmatprep.subr.mxu1 %v1177_v6 }
  0x96   : > { %1142 = vmatpush3.msra.mxu0 %v1009_v30  ;;  %640 = vmatpush1.msra.mxu1 %v1029_v41 }
  0x97   : > { %1143 = vmatprep.subr.mxu0 %v1008_v31  ;;  %641 = vmatprep.subr.mxu1 %v1177_v6 }
  0x98   : > { %1144 = vmatpush3.msra.mxu0 %v1008_v31  ;;  %642 = vmatpush1.msra.mxu1 %v1028_v43 }
  0x99   : > { %1145 = vmatprep.subr.mxu0 %v1007_v32  ;;  %643 = vmatprep.subr.mxu1 %v1177_v6 }
  0x9a   : > { %1146 = vmatpush3.msra.mxu0 %v1007_v32  ;;  %644 = vmatpush1.msra.mxu1 %v1027_v45  ;;  %v1052_v45 = vld [vmem:[%s1587_s3 + $0x198] sm:$0xff] }
  0x9b   : > { %1147 = vmatprep.subr.mxu0 %v1006_v33  ;;  %645 = vmatprep.subr.mxu1 %v1177_v6 }
  0x9c   : > { %1148 = vmatpush3.msra.mxu0 %v1006_v33  ;;  %646 = vmatpush1.msra.mxu1 %v1026_v47 }
  0x9d   : > { %1149 = vmatprep.subr.mxu0 %v1005_v34  ;;  %647 = vmatprep.subr.mxu1 %v1177_v6 }
  0x9e   : > { %1150 = vmatpush3.msra.mxu0 %v1005_v34  ;;  %648 = vmatpush1.msra.mxu1 %v1025_v49 }
  0x9f   : > { %1151 = vmatprep.subr.mxu0 %v1004_v35  ;;  %649 = vmatprep.subr.mxu1 %v1177_v6 }
  0xa0   : > { %1152 = vmatpush3.msra.mxu0 %v1004_v35  ;;  %650 = vmatpush1.msra.mxu1 %v1024_v51  ;;  %v1051_v51 = vld [vmem:[%s1587_s3 + $0x190] sm:$0xff] }
  0xa1   : > { %1153 = vmatprep.subr.mxu0 %v1003_v36  ;;  %651 = vmatprep.subr.mxu1 %v1177_v6 }
  0xa2   : > { %1154 = vmatpush3.msra.mxu0 %v1003_v36  ;;  %652 = vmatpush1.msra.mxu1 %v1023_v53  ;;  %v1050_v53 = vld [vmem:[%s1587_s3 + $0x188] sm:$0xff] }
  0xa3   : > { %1156 = vmatmul.mubr.msk.f32.vlgmr.msra.gmra.mxu0 %vm227_vm0, %v429_v37  ;;  %717 = vmatprep.subr.mxu0 %v1177_v6 }
  0xa4   : > { %718 = vmatpush1.msra.mxu0 %v588_v38  ;;  %653 = vmatprep.subr.mxu1 %v1177_v6 }
  0xa5   : > { %719 = vmatprep.subr.mxu0 %v1177_v6  ;;  %654 = vmatpush1.msra.mxu1 %v1022_v55 }
  0xa6   : > { %720 = vmatpush1.msra.mxu0 %v587_v39  ;;  %655 = vmatprep.subr.mxu1 %v1177_v6 }
  0xa7   : > { %721 = vmatprep.subr.mxu0 %v1177_v6  ;;  %656 = vmatpush1.msra.mxu1 %v1021_v61  ;;  %v1045_v61 = vld [vmem:[%s1587_s3 + $0x160] sm:$0xff] }
  0xa8   : > { %722 = vmatpush1.msra.mxu0 %v586_v42  ;;  %657 = vmatprep.subr.mxu1 %v1177_v6 }
  0xa9   : > { %723 = vmatprep.subr.mxu0 %v1177_v6  ;;  %658 = vmatpush1.msra.mxu1 %v1020_v63  ;;  %v1043_v63 = vld [vmem:[%s1587_s3 + $0x150] sm:$0xff] }
  0xaa   : > { %724 = vmatpush1.msra.mxu0 %v585_v44  ;;  %659 = vmatprep.subr.mxu1 %v1177_v6 }
  0xab   : > { %725 = vmatprep.subr.mxu0 %v1177_v6  ;;  %660 = vmatpush1.msra.mxu1 %v1019_v3  ;;  %v1039_v3 = vld [vmem:[%s1587_s3 + $0x130] sm:$0xff] }
  0xac   : > { %726 = vmatpush1.msra.mxu0 %v584_v46  ;;  %661 = vmatprep.subr.mxu1 %v1177_v6 }
  0xad   : > { %727 = vmatprep.subr.mxu0 %v1177_v6  ;;  %662 = vmatpush1.msra.mxu1 %v1018_v11  ;;  %v1053_v11 = vld [vmem:[%s1587_s3 + $0x1a0] sm:$0xff] }
  0xae   : > { %728 = vmatpush1.msra.mxu0 %v583_v48  ;;  %663 = vmatprep.subr.mxu1 %v1177_v6 }
  0xaf   : > { %729 = vmatprep.subr.mxu0 %v1177_v6  ;;  %664 = vmatpush1.msra.mxu1 %v1017_v14 }
  0xb0   : > { %730 = vmatpush1.msra.mxu0 %v582_v50  ;;  %665 = vmatprep.subr.mxu1 %v1177_v6 }
  0xb1   : > { %731 = vmatprep.subr.mxu0 %v1177_v6  ;;  %666 = vmatpush1.msra.mxu1 %v1016_v18 }
  0xb2   : > { %732 = vmatpush1.msra.mxu0 %v581_v52  ;;  %667 = vmatprep.subr.mxu1 %v1177_v6 }
  0xb3   : > { %733 = vmatprep.subr.mxu0 %v1177_v6  ;;  %668 = vmatpush1.msra.mxu1 %v1015_v24 }
  0xb4   : > { %734 = vmatpush1.msra.mxu0 %v580_v54  ;;  %697 = vmatprep.subr.mxu1 %v1177_v6 }
  0xb5   : > { %735 = vmatprep.subr.mxu0 %v1177_v6  ;;  %698 = vmatpush2.msra.mxu1 %v1032_v25 }
  0xb6   : > { %736 = vmatpush1.msra.mxu0 %v579_v56  ;;  %699 = vmatprep.subr.mxu1 %v1177_v6 }
  0xb7   : > { %737 = vmatprep.subr.mxu0 %v1177_v6  ;;  %700 = vmatpush2.msra.mxu1 %v1031_v27 }
  0xb8   : > { %738 = vmatpush1.msra.mxu0 %v578_v57  ;;  %836 = vmatprep.subr.mxu1 %v1177_v6  ;;  %v1049_v57 = vld [vmem:[%s1587_s3 + $0x180] sm:$0xff] }
  0xb9   : > { %739 = vmatprep.subr.mxu0 %v1177_v6 }
  0xba   : > { %740 = vmatpush1.msra.mxu0 %v577_v58  ;;  %v1048_v58 = vld [vmem:[%s1587_s3 + $0x178] sm:$0xff] }
  0xbb   : > { %741 = vmatprep.subr.mxu0 %v1177_v6 }
  0xbc   : > { %742 = vmatpush1.msra.mxu0 %v576_v62  ;;  %v1044_v62 = vld [vmem:[%s1587_s3 + $0x158] sm:$0xff] }
  0xbd   : > { %743 = vmatprep.subr.mxu0 %v1177_v6 }
  0xbe   : > { %744 = vmatpush1.msra.mxu0 %v575_v0  ;;  %v1042_v0 = vld [vmem:[%s1587_s3 + $0x148] sm:$0xff] }
  0xbf   : > { %745 = vmatprep.subr.mxu0 %v1177_v6 }
  0xc0   : > { %746 = vmatpush1.msra.mxu0 %v574_v4  ;;  %v1038_v4 = vld [vmem:[%s1587_s3 + $0x128] sm:$0xff] }
  0xc1   : > { %747 = vmatprep.subr.mxu0 %v1177_v6 }
  0xc2   : > { %748 = vmatpush1.msra.mxu0 %v573_v12 }
  0xc3   : > { %777 = vmatprep.subr.mxu0 %v1177_v6 }
  0xc4   : > { %778 = vmatpush2.msra.mxu0 %v590_v15 }
  0xc5   : > { %779 = vmatprep.subr.mxu0 %v1177_v6 }
  0xc6   : > { %780 = vmatpush2.msra.mxu0 %v589_v19 }
 0x151   : > { %v1115_v59 = vpop.f32.mrf.mxu0 }
 0x152   : > { %v1136_v60 = vpop.f32.mrf.mxu1 }
 0x153   : > { %v338_v1 = vpop.f32.mrf.mxu0  ;;  %v425_v5 = vadd.f32 %v1136_v60, %v1115_v59  ;;  %v1047_v59 = vld [vmem:[%s1587_s3 + $0x170] sm:$0xff]  ;;  %v1046_v60 = vld [vmem:[%s1587_s3 + $0x168] sm:$0xff] }
 0x154   : > { %v419_v2 = vpop.f32.mrf.mxu1 }
 0x155   : > { %v420_v9 = vadd.f32 %v419_v2, %v338_v1  ;;  %v1041_v1 = vld [vmem:[%s1587_s3 + $0x140] sm:$0xff]  ;;  %v1040_v2 = vld [vmem:[%s1587_s3 + $0x138] sm:$0xff] }
 0x163   : > { %v1157_v7 = vpop.f32.mrf.mxu0 }
 0x164   : > { %v522_v10 = vadd.f32 %v1157_v7, %v425_v5  ;;  %v1037_v5 = vld [vmem:[%s1587_s3 + $0x120] sm:$0xff]  ;;  %v1054_v7 = vld [vmem:[%s1587_s3 + $0x1a8] sm:$0xff] }
 0x165   : > { %v512_v13 = vpop.f32.mrf.mxu0 }
 0x166   : > { %v531_v16 = vadd.f32 %v1014_v8, %v522_v10  ;;  %v521_v17 = vadd.f32 %v512_v13, %v420_v9 }
 0x168   : > { %v533_v20 = vmax.f32 %v531_v16, 0.0  ;;  %v530_v21 = vadd.f32 %v1014_v8, %v521_v17 }
 0x16a   : > { %v546_v22 = vrot.slane %v533_v20, 7  ;;  %v532_v23 = vmax.f32 %v530_v21, 0.0 }
 0x16c   : > { %552 = vrot.lane.b32.xlu0 %v546_v22, %s1179_s16  ;;  %v545_v26 = vrot.slane %v532_v23, 7 }
 0x16e   : > { %548 = vrot.lane.b32.xlu1 %v545_v26, %s1179_s16  ;;  %v547_v28 = vsel %vm544_vm5, %v545_v26, %v546_v22 }
 0x172   : > { %550 = vrot.lane.b32.xlu1 %v547_v28, %s1179_s16  ;;  %v1057_v28 = vld [vmem:[%s1588_s4] ss:$0 sm:$0xff] }
 0x1de   : > { %v553_v29 = vpop.permute.xlu0 %552 }
 0x1df   : > { %566 = vst.msk [vmem:[#allocation3 + $0x20] sm:$0x1] %vm565_vm6, %v553_v29 }
 0x1e0   : > { %568 = vst.msk [vmem:[#allocation3 + $0x28] sm:$0x1] %vm567_vm7, %v553_v29  ;;  %v549_v30 = vpop.permute.xlu1 %548 }
 0x1e1   : > { %558 = vst.msk [vmem:[#allocation3] sm:$0xfe] %vm557_vm8, %v549_v30 }
 0x1e2   : > { %560 = vst.msk [vmem:[#allocation3 + $0x8] sm:$0xfe] %vm559_vm9, %v549_v30 }
 0x1e4   : > { %v551_v31 = vpop.permute.xlu1 %550 }
 0x1e5   : > { %562 = vst.msk [vmem:[#allocation3 + $0x10] sm:$0xff] %vm561_vm10, %v551_v31 }
 0x1e6   : > { %564 = vst.msk [vmem:[#allocation3 + $0x18] sm:$0xff] %vm563_vm11, %v551_v31  ;;  %v593_v47 = vld [vmem:[#allocation3 + $0x20] sm:$0x1] }
 0x1e7   : > { %v594_v38 = vld [vmem:[#allocation3 + $0x28] sm:$0x1]  ;;  %v627_v52 = vrot.slane %v593_v47, 1  ;;  %v794_v14 = vld [vmem:[#allocation3 + $0x20] sm:$0x3] }
 0x1e8   : > { %v569_v33 = vld [vmem:[#allocation3] sm:$0xff]  ;;  %v629_v46 = vrot.slane %v594_v38, 1  ;;  %v795_v10 = vld [vmem:[#allocation3 + $0x28] sm:$0x3]  ;;  %v826_v17 = vrot.slane %v794_v14, 2 }
 0x1e9   : > { %v570_v32 = vld [vmem:[#allocation3 + $0x8] sm:$0xff]  ;;  %v591_v35 = vld [vmem:[#allocation3] sm:$0xfe]  ;;  %v828_v13 = vrot.slane %v795_v10, 2 }
 0x1ea   : > { %1035 = vmatprep.mubr.msk.f32.mxu0 %vm535_vm4, %v570_v32  ;;  %v592_v34 = vld [vmem:[#allocation3 + $0x8] sm:$0xfe]  ;;  %v621_v42 = vrot.slane %v591_v35, 1  ;;  %v792_v8 = vld [vmem:[#allocation3] sm:$0xfc] }
 0x1eb   : > { %782 = vmatmul.mubr.f32.vlgmr.msra.gmra.mxu0 %v569_v33  ;;  %v624_v41 = vrot.slane %v592_v34, 1  ;;  %v793_v48 = vld [vmem:[#allocation3 + $0x8] sm:$0xfc]  ;;  %v820_v12 = vrot.slane %v792_v8, 2 }
 0x1ec   : > { %v1477_v37 = vld [vmem:[#allocation3 + $0x10] sm:$0xff]  ;;  %v823_v54 = vrot.slane %v793_v48, 2 }
 0x1ed   : > { %v1475_v36 = vld [vmem:[#allocation3 + $0x18] sm:$0xff]  ;;  %v622_v40 = vrot.slane %v1477_v37, 1  ;;  %v821_v9 = vrot.slane %v1477_v37, 2 }
 0x1ee   : > { %v625_v39 = vrot.slane %v1475_v36, 1  ;;  %1036 = vmatprep.mubr.msk.f32.mxu0 %vm535_vm4, %v1475_v36  ;;  %v824_v49 = vrot.slane %v1475_v36, 2 }
 0x1ef   : > { %787 = vmatmul.mubr.f32.gmra.mxu0 %v1477_v37  ;;  %v623_v44 = vsel %vm620_vm12, %v621_v42, %v622_v40  ;;  %v628_v55 = vsel %vm620_vm12, %v622_v40, %v627_v52  ;;  %v822_v15 = vsel %vm819_vm13, %v820_v12, %v821_v9  ;;  %v827_v18 = vsel %vm819_vm13, %v821_v9, %v826_v17 }
 0x1f0   : > { %v626_v43 = vsel %vm620_vm12, %v624_v41, %v625_v39  ;;  %v630_v50 = vsel %vm620_vm12, %v625_v39, %v629_v46  ;;  %v825_v56 = vsel %vm819_vm13, %v823_v54, %v824_v49  ;;  %v829_v16 = vsel %vm819_vm13, %v824_v49, %v828_v13 }
 0x1f1   : > { %1033 = vmatprep.mubr.msk.f32.mxu1 %vm535_vm4, %v626_v43 }
 0x1f2   : > { %702 = vmatmul.mubr.f32.vlgmr.msra.gmra.mxu1 %v623_v44 }
 0x1f3   : > { %837 = vmatpush1.msra.mxu1 %v1052_v45  ;;  %1034 = vmatprep.mubr.msk.f32.mxu1 %vm535_vm4, %v630_v50 }
 0x1f4   : > { %838 = vmatprep.subr.mxu1 %v1177_v6 }
 0x1f5   : > { %839 = vmatpush1.msra.mxu1 %v1051_v51 }
 0x1f6   : > { %840 = vmatprep.subr.mxu1 %v1177_v6  ;;  %707 = vmatmul.mubr.f32.gmra.mxu1 %v628_v55 }
 0x1f7   : > { %841 = vmatpush1.msra.mxu1 %v1050_v53  ;;  %1055 = vmatprep.mubr.msk.f32.mxu1 %vm535_vm4, %v825_v56 }
 0x1f8   : > { %842 = vmatprep.subr.mxu1 %v1177_v6 }
 0x1f9   : > { %843 = vmatpush1.msra.mxu1 %v1049_v57 }
 0x1fa   : > { %844 = vmatprep.subr.mxu1 %v1177_v6 }
 0x1fb   : > { %845 = vmatpush1.msra.mxu1 %v1048_v58 }
 0x1fc   : > { %846 = vmatprep.subr.mxu1 %v1177_v6 }
 0x1fd   : > { %847 = vmatpush1.msra.mxu1 %v1047_v59 }
 0x1fe   : > { %848 = vmatprep.subr.mxu1 %v1177_v6 }
 0x1ff   : > { %849 = vmatpush1.msra.mxu1 %v1046_v60 }
 0x200   : > { %850 = vmatprep.subr.mxu1 %v1177_v6 }
 0x201   : > { %851 = vmatpush1.msra.mxu1 %v1045_v61 }
 0x202   : > { %852 = vmatprep.subr.mxu1 %v1177_v6 }
 0x203   : > { %853 = vmatpush1.msra.mxu1 %v1044_v62 }
 0x204   : > { %854 = vmatprep.subr.mxu1 %v1177_v6 }
 0x205   : > { %855 = vmatpush1.msra.mxu1 %v1043_v63 }
 0x206   : > { %856 = vmatprep.subr.mxu1 %v1177_v6 }
 0x207   : > { %857 = vmatpush1.msra.mxu1 %v1042_v0 }
 0x208   : > { %858 = vmatprep.subr.mxu1 %v1177_v6 }
 0x209   : > { %859 = vmatpush1.msra.mxu1 %v1041_v1 }
 0x20a   : > { %860 = vmatprep.subr.mxu1 %v1177_v6 }
 0x20b   : > { %861 = vmatpush1.msra.mxu1 %v1040_v2 }
 0x20c   : > { %862 = vmatprep.subr.mxu1 %v1177_v6 }
 0x20d   : > { %863 = vmatpush1.msra.mxu1 %v1039_v3 }
 0x20e   : > { %864 = vmatprep.subr.mxu1 %v1177_v6 }
 0x20f   : > { %865 = vmatpush1.msra.mxu1 %v1038_v4 }
 0x210   : > { %866 = vmatprep.subr.mxu1 %v1177_v6 }
 0x211   : > { %867 = vmatpush1.msra.mxu1 %v1037_v5 }
 0x212   : > { %896 = vmatprep.subr.mxu1 %v1177_v6 }
 0x213   : > { %897 = vmatpush2.msra.mxu1 %v1054_v7 }
 0x214   : > { %898 = vmatprep.subr.mxu1 %v1177_v6 }
 0x215   : > { %899 = vmatpush2.msra.mxu1 %v1053_v11 }
 0x216   : > { %901 = vmatmul.mubr.f32.vlgmr.msra.gmra.mxu1 %v822_v15 }
 0x217   : > { %1056 = vmatprep.mubr.msk.f32.mxu1 %vm535_vm4, %v829_v16 }
 0x21a   : > { %906 = vmatmul.mubr.f32.gmra.mxu1 %v827_v18 }
 0x2ab   : > { %v783_v19 = vpop.f32.mrf.mxu0 }
 0x2ad   : > { %v785_v20 = vpop.f32.mrf.mxu0 }
 0x2af   : > { %v788_v6 = vpop.f32.mrf.mxu0 }
 0x2b1   : > { %v790_v21 = vpop.f32.mrf.mxu0 }
 0x2b2   : > { %v703_v22 = vpop.f32.mrf.mxu1 }
 0x2b3   : > { %v784_v26 = vadd.f32 %v783_v19, %v703_v22 }
 0x2b4   : > { %v705_v23 = vpop.f32.mrf.mxu1 }
 0x2b6   : > { %v708_v24 = vpop.f32.mrf.mxu1 }
 0x2b7   : > { %v789_v31 = vadd.f32 %v788_v6, %v708_v24 }
 0x2b8   : > { %v710_v25 = vpop.f32.mrf.mxu1 }
 0x2d6   : > { %v902_v27 = vpop.f32.mrf.mxu1 }
 0x2d7   : > { %v911_v29 = vadd.f32 %v902_v27, %v784_v26 }
 0x2d8   : > { %v904_v30 = vpop.f32.mrf.mxu1 }
 0x2d9   : > { %v920_v32 = vadd.f32 %v1057_v28, %v911_v29 }
 0x2da   : > { %v907_v33 = vpop.f32.mrf.mxu1 }
 0x2db   : > { %v922_v34 = vmax.f32 %v920_v32, 0.0  ;;  %v912_v35 = vadd.f32 %v907_v33, %v789_v31 }
 0x2dc   : > { %v909_v36 = vpop.f32.mrf.mxu1 }
 0x2dd   : > { %924 = vst [vmem:[%s224_s15] sm:$0xff] %v922_v34  ;;  %v921_v37 = vadd.f32 %v1057_v28, %v912_v35 }
 0x2df   : > { %v923_v38 = vmax.f32 %v921_v37, 0.0 }
 0x2e1   : > { %925 = vst [vmem:[%s224_s15 + $0x8] sm:$0xff] %v923_v38 }
 0x2e2 PF: > { %s15_s18 = sadd.s32 1, %s1175_s18  }
 0x2e3   : > { %p12_p4 = scmp.ge.s32.totalorder %s15_s18, 4  }
 0x2e5   :  { %14 = sbr.rel (!%p12_p4) target bundleno = 1 (0x1), region = 74 }

</bundles_post_ra>
